<compile_context>
chip_gen: v7x
topology: tpu7x:2x2x1
jax: 0.10.0
libtpu: 0.0.40
codegen_flags: <defaults>
</compile_context>

<pallas_src>
import functools

import jax
import jax.numpy as jnp
from jax import lax
from jax.experimental import pallas as pl
from jax.experimental.pallas import tpu as pltpu


_BATCHED_MM = (((2,), (1,)), ((0,), (0,)))   # standard batched [B,M,K] x [B,K,N]


# ---------------------------------------------------------------------------
# Kernels
# ---------------------------------------------------------------------------
def _fused_kernel(x1_ref, x2_ref, out_ref, *, s, compute_dtype):
    """One batch block per step; fused (bt, S, 2S) output (requires S % 128 == 0)."""
    x1 = x1_ref[...]
    x2 = x2_ref[...]

    # v6 = x1 @ x2 -- compute + store first so only one f32 (bt,S,S)
    # intermediate is live at a time (less spill pressure).
    v6 = lax.dot_general(x1, x2, _BATCHED_MM, preferred_element_type=jnp.float32)
    out_ref[:, :, s:] = v6.astype(out_ref.dtype)

    # v5 = x1^T @ x1^T @ x2^T = (x2 @ (x1 @ x1))^T : standard matmuls + 1 transpose.
    w = lax.dot_general(x1, x1, _BATCHED_MM, preferred_element_type=jnp.float32)
    u = lax.dot_general(x2, w.astype(compute_dtype), _BATCHED_MM,
                        preferred_element_type=jnp.float32)
    out_ref[:, :, :s] = jnp.swapaxes(u, 1, 2).astype(out_ref.dtype)


def _split_kernel(x1_ref, x2_ref, v5_ref, v6_ref, *, compute_dtype):
    """Two lane-dense full-block outputs (used when S % 128 != 0).

    Keeps the (previously validated) transposed-contraction formulation: for
    small / non-128 S lane padding dominates anyway, and it avoids an explicit
    odd-shape transpose.
    """
    x1 = x1_ref[...]
    x2 = x2_ref[...]
    # v6 = x1 @ x2 (stored first -- interleaved compute/store)
    v6_ref[...] = lax.dot_general(
        x1, x2, _BATCHED_MM, preferred_element_type=jnp.float32).astype(v6_ref.dtype)
    # v4[b,i,k] = sum_j x1[b,j,i] * x1[b,k,j]  == (x1^T @ x1^T)[i,k]
    v4 = lax.dot_general(x1, x1, (((1,), (2,)), ((0,), (0,))),
                         preferred_element_type=jnp.float32)
    # v5[b,i,k] = sum_j v4[b,i,j] * x2[b,k,j]  == (v4 @ x2^T)[i,k]
    v5 = lax.dot_general(v4.astype(compute_dtype), x2, (((2,), (2,)), ((0,), (0,))),
                         preferred_element_type=jnp.float32)
    v5_ref[...] = v5.astype(v5_ref.dtype)


def _tiled_kernel(x1_ref, x2row_ref, x2col_ref, v5_ref, v6_ref, w_ref):
    """Large-S variant: grid (batch_blocks, ceil(S/tn)).

    w = x1 @ x1 is computed once per batch block (n == 0) into persistent VMEM
    scratch; each n step emits the (S, tn) column tiles of v5 and v6.
    """
    n = pl.program_id(1)

    @pl.when(n == 0)
    def _():
        x1 = x1_ref[...]
        w = lax.dot_general(x1, x1, _BATCHED_MM, preferred_element_type=jnp.float32)
        w_ref[...] = w.astype(w_ref.dtype)

    # v6[:, :, n-tile] = x1 @ x2[:, :, n-tile]
    v6 = lax.dot_general(x1_ref[...], x2col_ref[...], _BATCHED_MM,
                         preferred_element_type=jnp.float32)
    v6_ref[...] = v6.astype(v6_ref.dtype)

    # v5[:, :, n-tile] = (x2[:, n-tile, :] @ w)^T
    u = lax.dot_general(x2row_ref[...], w_ref[...], _BATCHED_MM,
                        preferred_element_type=jnp.float32)
    v5_ref[...] = jnp.swapaxes(u, 1, 2).astype(v5_ref.dtype)


# ---------------------------------------------------------------------------
# Wrapper
# ---------------------------------------------------------------------------
def _vmem_caps():
    """(tile-sizing budget, explicit scoped limit) derived from the chip."""
    try:
        cap = int(pltpu.get_tpu_info().vmem_capacity_bytes)
    except Exception:
        cap = 64 * 1024 * 1024                 # safe fallback for v5e/v6e/v7x
    return int(cap * 0.60), int(cap * 0.85)


def permute_matmul_fusion(x1, x2, *, precision="bf16", _force_tiled=False, _tn=None):
    """out = cat([x1^T @ x1^T @ x2^T, x1 @ x2], axis=2).

    precision="bf16" (default): operands are cast to bf16 in the wrapper and
    all matmuls run bf16 x bf16 -> f32 on the MXU (2-4x matmul throughput,
    half the input DMA bytes).  Relative error is ~bf16-level and grows with
    S; use precision="f32" for full-precision operands.
    """
    assert x1.shape == x2.shape, "x1 and x2 must have identical shapes"
    b, s, s2 = x1.shape
    assert s == s2, "bmm chain requires square per-batch matrices"

    out_dtype = x1.dtype
    compute_dtype = jnp.bfloat16 if precision == "bf16" else x1.dtype
    cbytes = jnp.dtype(compute_dtype).itemsize
    obytes = jnp.dtype(out_dtype).itemsize

    # Cast in the wrapper (not in the kernel): halves HBM->VMEM DMA bytes and
    # halves the double-buffered input VMEM footprint.
    x1c = x1.astype(compute_dtype)
    x2c = x2.astype(compute_dtype)

    budget, vmem_limit = _vmem_caps()

    cost = pl.CostEstimate(
        flops=int(3 * 2 * b * s ** 3),
        transcendentals=0,
        bytes_accessed=int(2 * b * s * s * cbytes + 2 * b * s * s * obytes),
    )

    # Per-batch-element working set for the single-step kernel:
    # double-buffered inputs + double-buffered output + ~3 f32 intermediates.
    per_batch = s * s * (4 * cbytes + 4 * obytes + 3 * 4)
    cap_bt = budget // max(per_batch, 1)

    if cap_bt >= 1 and not _force_tiled:
        # ------------------------------------------------------------------
        # Path 1: full (S, S) matrices per step; grid over batch blocks only.
        # Keep >= 2 grid steps when B >= 2 so the parallel batch axis can
        # shard across v7x's two TensorCores (and pipeline on v5e/v6e).
        # ------------------------------------------------------------------
        bt = max(1, min(cap_bt, pl.cdiv(b, 2)))
        grid = (pl.cdiv(b, bt),)
        cparams = pltpu.CompilerParams(
            dimension_semantics=("parallel",),
            vmem_limit_bytes=vmem_limit,
        )
        in_specs = [
            pl.BlockSpec((bt, s, s), lambda i: (i, 0, 0)),
            pl.BlockSpec((bt, s, s), lambda i: (i, 0, 0)),
        ]

        if s % 128 == 0:
            # Fused (B, S, 2S) output: both column halves start at multiples of
            # 128 -> unmasked aligned stores, and no wrapper-concat round trip.
            kernel = functools.partial(_fused_kernel, s=s, compute_dtype=compute_dtype)
            out = pl.pallas_call(
                kernel,
                out_shape=jax.ShapeDtypeStruct((b, s, 2 * s), out_dtype),
                grid_spec=pltpu.PrefetchScalarGridSpec(
                    num_scalar_prefetch=0,
                    grid=grid,
                    in_specs=in_specs,
                    out_specs=pl.BlockSpec((bt, s, 2 * s), lambda i: (i, 0, 0)),
                ),
                compiler_params=cparams,
                cost_estimate=cost,
            )(x1c, x2c)
            return out

        # S not a multiple of 128: two lane-dense full-block outputs + wrapper
        # concat (in-kernel offset-S stores would be masked partial stores).
        # TODO(synk): for S < 128 this path is MXU/lane-starved (tiles are
        # lane-padded to 128); a lane-dense (b*S, S) repack or a plain XLA bmm
        # would be faster for tiny S.
        kernel = functools.partial(_split_kernel, compute_dtype=compute_dtype)
        v5, v6 = pl.pallas_call(
            kernel,
            out_shape=(
                jax.ShapeDtypeStruct((b, s, s), out_dtype),
                jax.ShapeDtypeStruct((b, s, s), out_dtype),
            ),
            grid_spec=pltpu.PrefetchScalarGridSpec(
                num_scalar_prefetch=0,
                grid=grid,
                in_specs=in_specs,
                out_specs=[
                    pl.BlockSpec((bt, s, s), lambda i: (i, 0, 0)),
                    pl.BlockSpec((bt, s, s), lambda i: (i, 0, 0)),
                ],
            ),
            compiler_params=cparams,
            cost_estimate=cost,
        )(x1c, x2c)
        return jnp.concatenate([v5, v6], axis=2)

    # ----------------------------------------------------------------------
    # Path 2: large-S tiled variant.  grid = (batch blocks, ceil(S/tn)); the
    # n axis is "arbitrary" because w = x1 @ x1 is computed once per batch
    # block (n == 0) into persistent VMEM scratch and reused for every tile.
    # ----------------------------------------------------------------------
    bt = 1
    if _tn is not None:
        tn = int(_tn)
    else:
        fixed = s * s * cbytes * (2 + 1)                    # x1 (double-buffered) + w scratch
        per_tn = s * (4 * cbytes + 4 * obytes + 2 * 4)      # x2 row/col + v5/v6 tiles (db) + f32 temps
        tn_cap = max(budget - fixed, 0) // max(per_tn, 1)
        tn = min(s, max(128, (tn_cap // 128) * 128))
    # TODO(synk): for S large enough that x1 + w alone exceed VMEM, a second
    # level of K-tiling over w would be required as well.

    grid = (pl.cdiv(b, bt), pl.cdiv(s, tn))
    v5, v6 = pl.pallas_call(
        _tiled_kernel,
        out_shape=(
            jax.ShapeDtypeStruct((b, s, s), out_dtype),
            jax.ShapeDtypeStruct((b, s, s), out_dtype),
        ),
        grid_spec=pltpu.PrefetchScalarGridSpec(
            num_scalar_prefetch=0,
            grid=grid,
            in_specs=[
                pl.BlockSpec((bt, s, s), lambda i, n: (i, 0, 0)),    # x1 (full)
                pl.BlockSpec((bt, tn, s), lambda i, n: (i, n, 0)),   # x2 row tile
                pl.BlockSpec((bt, s, tn), lambda i, n: (i, 0, n)),   # x2 col tile
            ],
            out_specs=[
                pl.BlockSpec((bt, s, tn), lambda i, n: (i, 0, n)),   # v5 tile
                pl.BlockSpec((bt, s, tn), lambda i, n: (i, 0, n)),   # v6 tile
            ],
            scratch_shapes=[pltpu.VMEM((bt, s, s), compute_dtype)],
        ),
        compiler_params=pltpu.CompilerParams(
            dimension_semantics=("parallel", "arbitrary"),
            vmem_limit_bytes=vmem_limit,
        ),
        cost_estimate=cost,
    )(x1c, x2c, x2c)
    # Wrapper concat costs one extra output HBM round trip; acceptable here
    # because the tiled (large-S) path is MXU-bound.
    return jnp.concatenate([v5, v6], axis=2)


# ---------------------------------------------------------------------------
# Reference & test
# ---------------------------------------------------------------------------
def _reference(x1, x2, compute_dtype=None):
    if compute_dtype is not None:
        x1 = x1.astype(compute_dtype)
        x2 = x2.astype(compute_dtype)
    x1t = jnp.swapaxes(x1, 1, 2)
    x2t = jnp.swapaxes(x2, 1, 2)
    v4 = jnp.einsum("bij,bjk->bik", x1t, x1t, preferred_element_type=jnp.float32)
    v5 = jnp.einsum("bij,bjk->bik", v4.astype(x1.dtype), x2t,
                    preferred_element_type=jnp.float32)
    v6 = jnp.einsum("bij,bjk->bik", x1, x2, preferred_element_type=jnp.float32)
    return jnp.concatenate([v5, v6], axis=2)


def _max_rel_err(a, b):
    a = jnp.asarray(a, jnp.float32)
    b = jnp.asarray(b, jnp.float32)
    return float(jnp.max(jnp.abs(a - b)) / (jnp.max(jnp.abs(b)) + 1e-6))


if __name__ == "__main__":
    key = jax.random.PRNGKey(0)
    k1, k2, k3, k4, k5, k6 = jax.random.split(key, 6)

    # --- tiny shape (module spec is (1,2,2)-like): f32, split-output path ---
    B, S = 2, 16
    x1 = jax.random.normal(k1, (B, S, S), dtype=jnp.float32)
    x2 = jax.random.normal(k2, (B, S, S), dtype=jnp.float32)
    out = permute_matmul_fusion(x1, x2, precision="f32")
    jax.block_until_ready(out)
    ref = _reference(x1, x2)
    assert out.shape == (B, S, 2 * S)
    assert jnp.allclose(out, ref, atol=1e-4, rtol=1e-4), "f32 split path mismatch"

    # --- fused single-output path (S % 128 == 0), default bf16 MXU path ---
    B, S = 2, 128
    x1 = jax.random.normal(k3, (B, S, S), dtype=jnp.float32)
    x2 = jax.random.normal(k4, (B, S, S), dtype=jnp.float32)
    out = permute_matmul_fusion(x1, x2)            # precision="bf16" (default)
    jax.block_until_ready(out)
    ref = _reference(x1, x2, compute_dtype=jnp.bfloat16)
    assert out.shape == (B, S, 2 * S)
    assert _max_rel_err(out, ref) < 1e-2, "bf16 fused path mismatch"

    # --- large-S tiled path (forced with a small column tile to exercise it) ---
    B, S = 2, 256
    x1 = jax.random.normal(k5, (B, S, S), dtype=jnp.float32)
    x2 = jax.random.normal(k6, (B, S, S), dtype=jnp.float32)
    out = permute_matmul_fusion(x1, x2, _force_tiled=True, _tn=128)
    jax.block_until_ready(out)
    ref = _reference(x1, x2, compute_dtype=jnp.bfloat16)
    assert out.shape == (B, S, 2 * S)
    assert _max_rel_err(out, ref) < 1e-2, "bf16 tiled path mismatch"

    print("KERNEL_OK")
</pallas_src>

<mosaic_0001>
module attributes {stable_mosaic.version = 11 : i64} {
  func.func @_split_kernel(%arg0: i32, %arg1: memref<1x16x16xf32, #tpu.memory_space<vmem>>, %arg2: memref<1x16x16xf32, #tpu.memory_space<vmem>>, %arg3: memref<1x16x16xf32, #tpu.memory_space<vmem>>, %arg4: memref<1x16x16xf32, #tpu.memory_space<vmem>>) attributes {dimension_semantics = [#tpu.dimension_semantics<parallel>], iteration_bounds = array<i64: 2>, scalar_prefetch = 0 : i64, scratch_operands = 0 : i64, tpu.core_type = #tpu.core_type<tc>, window_params = [{transform_indices = @transform_0, window_bounds = array<i64: 1, 16, 16>}, {transform_indices = @transform_1, window_bounds = array<i64: 1, 16, 16>}, {transform_indices = @transform_2, window_bounds = array<i64: 1, 16, 16>}, {transform_indices = @transform_3, window_bounds = array<i64: 1, 16, 16>}]} {
    %c0 = arith.constant 0 : index
    %c0_0 = arith.constant 0 : index
    %c0_1 = arith.constant 0 : index
    %0 = vector.load %arg1[%c0, %c0_0, %c0_1] : memref<1x16x16xf32, #tpu.memory_space<vmem>>, vector<1x16x16xf32>
    %c0_2 = arith.constant 0 : index
    %c0_3 = arith.constant 0 : index
    %c0_4 = arith.constant 0 : index
    %1 = vector.load %arg2[%c0_2, %c0_3, %c0_4] : memref<1x16x16xf32, #tpu.memory_space<vmem>>, vector<1x16x16xf32>
    %cst = arith.constant dense<0.000000e+00> : vector<1x16x16xf32>
    %2 = tpu.matmul %0, %1, %cst {dimension_numbers = #tpu.dot_dimension_numbers<[2], [1], [1], [2], [0, 0, 0, 1, 1, 2], [0], [0]>} : vector<1x16x16xf32>, vector<1x16x16xf32>, vector<1x16x16xf32> -> vector<1x16x16xf32>
    %c0_5 = arith.constant 0 : index
    %c0_6 = arith.constant 0 : index
    %c0_7 = arith.constant 0 : index
    %3 = vector.load %arg4[%c0_5, %c0_6, %c0_7] : memref<1x16x16xf32, #tpu.memory_space<vmem>>, vector<1x16x16xf32>
    tpu.vector_store %arg4[%c0_5, %c0_6, %c0_7], %2 {strides = array<i32>} : memref<1x16x16xf32, #tpu.memory_space<vmem>>, vector<1x16x16xf32>,
    %cst_8 = arith.constant dense<0.000000e+00> : vector<1x16x16xf32>
    %4 = tpu.matmul %0, %0, %cst_8 {dimension_numbers = #tpu.dot_dimension_numbers<[1], [2], [2], [1], [0, 0, 0, 2, 1, 1], [0], [0]>} : vector<1x16x16xf32>, vector<1x16x16xf32>, vector<1x16x16xf32> -> vector<1x16x16xf32>
    %cst_9 = arith.constant dense<0.000000e+00> : vector<1x16x16xf32>
    %5 = tpu.matmul %4, %1, %cst_9 {dimension_numbers = #tpu.dot_dimension_numbers<[2], [2], [1], [1], [0, 0, 0, 1, 1, 1], [0], [0]>} : vector<1x16x16xf32>, vector<1x16x16xf32>, vector<1x16x16xf32> -> vector<1x16x16xf32>
    %c0_10 = arith.constant 0 : index
    %c0_11 = arith.constant 0 : index
    %c0_12 = arith.constant 0 : index
    %6 = vector.load %arg3[%c0_10, %c0_11, %c0_12] : memref<1x16x16xf32, #tpu.memory_space<vmem>>, vector<1x16x16xf32>
    tpu.vector_store %arg3[%c0_10, %c0_11, %c0_12], %5 {strides = array<i32>} : memref<1x16x16xf32, #tpu.memory_space<vmem>>, vector<1x16x16xf32>,
    return
  }
  func.func @transform_0(%arg0: i32) -> (i32, i32, i32) {
    %c0_i32 = arith.constant 0 : i32
    %c0_i32_0 = arith.constant 0 : i32
    %c0_i32_1 = arith.constant 0 : i32
    return %arg0, %c0_i32, %c0_i32_0 : i32, i32, i32
  }
  func.func @transform_1(%arg0: i32) -> (i32, i32, i32) {
    %c0_i32 = arith.constant 0 : i32
    %c0_i32_0 = arith.constant 0 : i32
    %c0_i32_1 = arith.constant 0 : i32
    return %arg0, %c0_i32, %c0_i32_0 : i32, i32, i32
  }
  func.func @transform_2(%arg0: i32) -> (i32, i32, i32) {
    %c0_i32 = arith.constant 0 : i32
    %c0_i32_0 = arith.constant 0 : i32
    %c0_i32_1 = arith.constant 0 : i32
    return %arg0, %c0_i32, %c0_i32_0 : i32, i32, i32
  }
  func.func @transform_3(%arg0: i32) -> (i32, i32, i32) {
    %c0_i32 = arith.constant 0 : i32
    %c0_i32_0 = arith.constant 0 : i32
    %c0_i32_1 = arith.constant 0 : i32
    return %arg0, %c0_i32, %c0_i32_0 : i32, i32, i32
  }
}

</mosaic_0001>

<bundles_post_ra>
// kernel: tpu_custom_call.1
= control target key start
LH: loop header
LB: loop body
LE: loop exit
PB: predicated region body
PF: predicated region fallthrough
CT: control target
= control target key end

     0   :  { %9 = vsyncpa [#allocation3], 0  ;;  %s1313_s0 = inlined_call_operand.hbm [shape: f32[2,16,16], index: 0, kind: input, shape index: {}]   ;;  %s1314_s1 = inlined_call_operand.hbm [shape: f32[2,16,16], index: 1, kind: input, shape index: {}]   ;;  %s1315_s2 = inlined_call_operand.hbm [shape: f32[2,16,16], index: 2, kind: output, shape index: {0}]   ;;  %s1316_s3 = inlined_call_operand.hbm [shape: f32[2,16,16], index: 3, kind: output, shape index: {1}]  }
   0x1   :  { %11 = vsyncpa [#allocation3 + $0x1], 0 }
   0x2   :  { %12 = vsyncpa [#allocation6], 0 }
   0x3   :  { %14 = vsyncpa [#allocation6 + $0x1], 0 }
   0x4   :  { %15 = vsyncpa [#allocation4], 0 }
   0x5   :  { %17 = vsyncpa [#allocation4 + $0x1], 0 }
   0x6   :  { %18 = vsyncpa [#allocation9], 0 }
   0x7   :  { %20 = vsyncpa [#allocation9 + $0x1], 0  ;;  %s1031_s12 = smov 0   ;;  %s1033_s13 = smov 0  }
   0x8   :  { %s1035_s14 = smov 0   ;;  %s1037_s15 = smov 0  }
   0x9 LB: > { %s1052_s16 = sadd.s32 4294967295, %s1001_s15   ;;  %s693_s17 = sadd.s32 4294967294, %s1001_s15   ;;  %s1001_s15 = sphi %s1037_s15, %s1332_s15   ;;  %s997_s14 = sphi %s1035_s14, %s1331_s14   ;;  %s993_s13 = sphi %s1033_s13, %s1330_s13   ;;  %s989_s12 = sphi %s1031_s12, %s1329_s12  }
   0xa   : > { %s1056_s18 = sadd.s32 1, %s1001_s15   ;;  %s33_s19 = sadd.s32 1, %s997_s14 }
   0xb   : > { %s30_s20 = ssub.s32 %s1001_s15, %s1056_s18  ;;  %p40_p0 = scmp.ne.s32.totalorder %s997_s14, %s993_s13 }
   0xc   : > { %p31_p1 = scmp.eq.s32.totalorder %s30_s20, 0  ;;  %p41_p2 = scmp.eq.s32.totalorder %s1001_s15, 0 }
   0xd   : > { %p46_p3 = scmp.ne.s32.totalorder %s993_s13, %s989_s12  ;;  %p47_p4 = scmp.eq.s32.totalorder %s1052_s16, 0 }
   0xe   : > { %s1068_s21 = scalar_select %p31_p1, %s997_s14, %s33_s19  }
   0xf   : > { %p1070_p5 = por %p41_p2, %p40_p0  ;;  %p1074_p6 = por %p47_p4, %p46_p3 }
  0x10   : > { %p96_p7 = scmp.eq.s32.totalorder %s1052_s16, 1  ;;  %p102_p8 = scmp.eq.s32.totalorder %s693_s17, 1 }
  0x11   : > { %s1320_s23 = scalar_select %p1074_p6, 1, 0 }
  0x12   : > { %p800_p10 = scmp.lt.s32.totalorder %s1001_s15, 2  ;;  %p1081_p11 = por %p96_p7, %p40_p0 }
  0x13   : > { %p1085_p12 = por %p102_p8, %p46_p3  ;;  %s1090_s26 = sand.u32 1, %s997_s14  }
  0x14   : > { %s1321_s24 = scalar_select %p1081_p11, 1, 0 }
  0x15   : > { %s1322_s25 = scalar_select %p1085_p12, 1, 0 }
  0x16   : > { %s725_s27 = sshll.u32 %s1001_s15, 8  ;;  %s696_s28 = sshll.u32 %s1090_s26, 4 }
  0x17   : > { %s1099_s4 = scalar_lea.hbm %s1313_s0, %s725_s27  ;;  %s152_s5 = scalar_lea.vmem [#allocation2], %s696_s28 }
  0x18   : > { %s159_s6 = sshll.u32 %s152_s5, 4  ;;  %p1105_p13 = pnand %p800_p10, %p1070_p5  ;;  %s1109_s6 = int_to_ptr.vmem [resolvable:$true] %s159_s6 }
  0x19   : > { %s149_s8 = scalar_lea.sflag [#allocation3], %s1090_s26  ;;  %s839_s9 = scalar_lea.hbm %s1099_s4, 256 }
  0x1a   : > { %p840_p0 = scmp.ne.s32.totalorder %s1099_s4, %s839_s9  ;;  %p841_p1 = pneg %p1105_p13 }
  0x1b   : > { %s844_s17 = scalar_lea.hbm %s1313_s0, 512  ;;  %p845_p4 = scmp.lt.u32.totalorder %s1099_s4, %s1313_s0 }
  0x1c   : > { %p842_p2 = pnand %p841_p1, %p840_p0  ;;  %p846_p5 = scmp.lt.u32.totalorder %s844_s17, %s839_s9 }
  0x1d   : > { %p848_p8 = scmp.lt.u32.totalorder %s839_s9, %s1099_s4 }
  0x1e   : > { %p843_p3 = pneg %p842_p2  ;;  %p847_p7 = por %p846_p5, %p845_p4 }
  0x20   : > { %p849_p10 = por %p848_p8, %p847_p7 }
  0x22   : > { %p850_p9 = pnand %p849_p10, %p843_p3 }
  0x24   : > { %853 = shalt.err (!%p850_p9)
}
  0x25   : > { %s854_s22 = scalar_lea.vmem %s1109_s6, 256  ;;  %s1003_s29 = smov [#allocation2]  }
  0x26   : > { %p855_p0 = scmp.ne.s32.totalorder %s1109_s6, %s854_s22  ;;  %s859_s30 = sshll.u32 %s1003_s29, 4  ;;  %s860_s30 = int_to_ptr.vmem [resolvable:$false] %s859_s30 }
  0x27   : > { %s861_s5 = scalar_lea.vmem %s860_s30, 512  ;;  %p862_p11 = scmp.lt.s32.totalorder %s1109_s6, %s860_s30 }
  0x28   : > { %p857_p2 = pnand %p855_p0, %p841_p1  ;;  %p863_p4 = scmp.lt.s32.totalorder %s861_s5, %s854_s22 }
  0x2a   : > { %p858_p12 = pneg %p857_p2  ;;  %p864_p5 = por %p863_p4, %p862_p11 }
  0x2c   : > { %p865_p7 = pnand %p864_p5, %p858_p12 }
  0x2e   : > { %868 = shalt.err (!%p865_p7)
}
  0x2f   : > { %s1004_s9 = smov 128   ;;  %s1005_s10 = smov 8  }
  0x30   : > { %789 = dma.hbm_to_vmem [thread:$0]  (!%p1105_p13), %s1099_s4, 256, %s1109_s6, %s149_s8, %s1004_s9, %s1004_s9, %s1005_s10  }
  0x31   : > { %p702_p9 = scmp.ge.s32.totalorder %s1001_s15, 1  ;;  %p188_p11 = scmp.lt.s32.totalorder %s1001_s15, 3 }
  0x32   : > { %s1153_s20 = scalar_lea.hbm %s1314_s1, %s725_s27  ;;  %s173_s22 = scalar_lea.vmem [#allocation5], %s696_s28 }
  0x33   : > { %p1144_p12 = pnand %p702_p9, %p188_p11  ;;  %s180_s29 = sshll.u32 %s173_s22, 4  ;;  %s1157_s29 = int_to_ptr.vmem [resolvable:$true] %s180_s29 }
  0x34   : > { %s170_s4 = scalar_lea.sflag [#allocation6], %s1090_s26  ;;  %s869_s6 = scalar_lea.hbm %s1153_s20, 256 }
  0x35   : > { %p870_p3 = scmp.ne.s32.totalorder %s1153_s20, %s869_s6  ;;  %s874_s27 = scalar_lea.hbm %s1314_s1, 512 }
  0x36   : > { %p875_p0 = scmp.lt.u32.totalorder %s1153_s20, %s1314_s1  ;;  %p876_p2 = scmp.lt.u32.totalorder %s874_s27, %s869_s6 }
  0x37   : > { %p872_p8 = pnand %p870_p3, %p841_p1  ;;  %p878_p5 = scmp.lt.u32.totalorder %s869_s6, %s1153_s20 }
  0x38   : > { %p877_p4 = por %p876_p2, %p875_p0 }
  0x39   : > { %p873_p10 = pneg %p872_p8 }
  0x3a   : > { %p879_p7 = por %p878_p5, %p877_p4 }
  0x3c   : > { %p880_p9 = pnand %p879_p7, %p873_p10 }
  0x3e   : > { %883 = shalt.err (!%p880_p9)
}
  0x3f   : > { %s884_s28 = scalar_lea.vmem %s1157_s29, 256  ;;  %s1006_s19 = smov [#allocation5]  }
  0x40   : > { %p885_p11 = scmp.ne.s32.totalorder %s1157_s29, %s884_s28  ;;  %s889_s22 = sshll.u32 %s1006_s19, 4  ;;  %s890_s22 = int_to_ptr.vmem [resolvable:$false] %s889_s22 }
  0x41   : > { %s891_s8 = scalar_lea.vmem %s890_s22, 512  ;;  %p892_p6 = scmp.lt.s32.totalorder %s1157_s29, %s890_s22 }
  0x42   : > { %p887_p3 = pnand %p885_p11, %p841_p1  ;;  %p893_p0 = scmp.lt.s32.totalorder %s891_s8, %s884_s28 }
  0x44   : > { %p888_p8 = pneg %p887_p3  ;;  %p894_p2 = por %p893_p0, %p892_p6 }
  0x46   : > { %p895_p4 = pnand %p894_p2, %p888_p8 }
  0x48   : > { %898 = shalt.err (!%p895_p4)
}
  0x49   : > { %792 = dma.hbm_to_vmem [thread:$0]  (!%p1105_p13), %s1153_s20, 256, %s1157_s29, %s170_s4, %s1004_s9, %s1004_s9, %s1005_s10  }
  0x4a   : > { %192 = sbr.rel (%p1144_p12) target bundleno = 659 (0x293), region = 28  ;;  %s1191_s6 = sand.u32 (!%p1144_p12), 1, %s993_s13  }
  0x4b   : > { %s1194_s30 = sshll.u32 (!%p1144_p12), %s1191_s6, 4  ;;  %s195_s7 = scalar_lea.sflag (!%p1144_p12), [#allocation3], %s1191_s6 }
  0x4c   : > { %s198_s27 = scalar_lea.vmem (!%p1144_p12), [#allocation2], %s1194_s30  ;;  %p1325_p6 = scmp.ne.s32.totalorder (!%p1144_p12), %s1320_s23, 0 }
  0x51   : > { %972 = dma.done.wait (%p1325_p6), %s195_s7, 256  }
  0x52   : > { %974 = vsyncadd (%p1325_p6), %s195_s7, 4294967040  ;;  %s204_s26 = scalar_lea.sflag [#allocation6], %s1191_s6  ;;  %s207_s9 = scalar_lea.vmem [#allocation5], %s1194_s30 }
  0x53   : > { %976 = dma.done.wait (%p1325_p6), %s204_s26, 256  }
  0x54   : > { %978 = vsyncadd (%p1325_p6), %s204_s26, 4294967040  ;;  %vm244_vm0 = vcmask 130048   ;;  %v240_v0 = vld [vmem:[%s198_s27] sm:$0xff]  ;;  %v241_v1 = vld [vmem:[%s198_s27 + $0x8] sm:$0xff]  ;;  %s239_s23 = scalar_lea.vmem [#allocation8], %s1194_s30  ;;  %s727_s11 = sshll.u32 %s1052_s16, 8 }
  0x55   : > { %vm767_vm1 = vmpackc.low %vm244_vm0, %vm244_vm0  ;;  %328 = vxpose.xlu0.b32.start [1/2] (short) (narrow) %v240_v0, 16  ;;  %v766_v2 = vpack.c.bf16 %v241_v1, %v240_v0  ;;  %745 = vmatprep.mubr.msk.f32.mxu0 %vm244_vm0, %v240_v0  ;;  %v242_v3 = vld [vmem:[%s207_s9] sm:$0xff]  ;;  %v243_v4 = vld [vmem:[%s207_s9 + $0x8] sm:$0xff]  ;;  %s565_s10 = sshll.u32 %s239_s23, 4  ;;  %s1227_s4 = scalar_lea.hbm %s1316_s3, %s727_s11  ;;  %s1220_s10 = int_to_ptr.vmem [resolvable:$true] %s565_s10 }
  0x56   : > { %v762_v5 = vpack.c.bf16 %v243_v4, %v242_v3  ;;  %s536_s5 = scalar_lea.sflag [#allocation9], %s1191_s6  ;;  %s899_s17 = scalar_lea.vmem %s1220_s10, 256 }
  0x57   : > { %768 = vmatprep.subr.msk.bf16.mxu1 %vm767_vm1, %v766_v2  ;;  %p900_p13 = scmp.ne.s32.totalorder %s1220_s10, %s899_s17  ;;  %p1326_p1 = scmp.ne.s32.totalorder %s1321_s24, 0 }
  0x58   : > { %771 = vmatpush3.bf16.xpose.msk.msra.mxu1 %vm767_vm1, %v766_v2  ;;  %763 = vmatprep.subr.bf16.mxu0 %v762_v5  ;;  %s1007_s28 = smov [#allocation8]  }
  0x59   : > { %329 = vxpose.xlu0.b32.end [2/2] (short) (narrow) %v241_v1, 16  ;;  %765 = vmatpush3.bf16.msra.mxu0 %v762_v5  ;;  %p901_p12 = pnand %p900_p13, %p1326_p1  ;;  %s903_s19 = sshll.u32 %s1007_s28, 4  ;;  %s904_s19 = int_to_ptr.vmem [resolvable:$false] %s903_s19 }
  0x5a   : > { %774 = vmatprep.subr.msk.bf16.mxu0 %vm767_vm1, %v762_v5  ;;  %s905_s22 = scalar_lea.vmem %s904_s19, 512  ;;  %p906_p5 = scmp.lt.s32.totalorder %s1220_s10, %s904_s19 }
  0x5b   : > { %p902_p10 = pneg %p901_p12  ;;  %p907_p7 = scmp.lt.s32.totalorder %s905_s22, %s899_s17 }
  0x5c   : > { %746 = vmatmul.mubr.msk.f32.vlgmr.msra.gmra.mrb[0].mxu0 %vm244_vm0, %v241_v1 }
  0x5d   : > { %p908_p9 = por %p907_p7, %p906_p5 }
  0x5f   : > { %p909_p11 = pnand %p908_p9, %p902_p10 }
  0x62   : > { %777 = vmatpush3.bf16.xpose.msk.msra.mxu0 %vm767_vm1, %v762_v5 }
  0xd5   : > { %v344_v6 = vpop.trf.xlu0 }
  0xd6   : > { %752 = vmatprep.mubr.msk.f32.mxu1 %vm244_vm0, %v344_v6 }
  0xd9   : > { %v345_v7 = vpop.trf.xlu0 }
  0xda   : > { %753 = vmatmul.mubr.msk.f32.vlgmr.msra.gmra.mrb[0].mxu1 %vm244_vm0, %v345_v7 }
 0x12f   : > { %v747_v8 = vpop.f32.mrb[0].mxu0 }
 0x130   : > { %327 = vst.msk [vmem:[%s239_s23 + $0x8] sm:$0xff] %vm244_vm0, %v747_v8  ;;  %v317_v9 = vpop.f32.mrb[1].mxu0 }
 0x131   : > { %326 = vst.msk [vmem:[%s239_s23] sm:$0xff] %vm244_vm0, %v317_v9 }
 0x1ad   : > { %v754_v10 = vpop.f32.mrb[0].mxu1 }
 0x1ae   : > { %v432_v11 = vpop.f32.mrb[1].mxu1 }
 0x1af   : > { %759 = vmatprep.mubr.msk.f32.mxu0 %vm244_vm0, %v432_v11 }
 0x1b0   : > { %760 = vmatmul.mubr.msk.f32.vlgmr.msra.gmra.mrb[2].mxu0 %vm244_vm0, %v754_v10 }
 0x1b1   : > { %912 = shalt.err (!%p909_p11)
}
 0x1b2   : > { %s913_s8 = scalar_lea.hbm %s1227_s4, 256  ;;  %s917_s26 = scalar_lea.hbm %s1316_s3, 512 }
 0x1b3   : > { %p914_p3 = scmp.ne.s32.totalorder %s1227_s4, %s913_s8  ;;  %p918_p2 = scmp.lt.u32.totalorder %s1227_s4, %s1316_s3 }
 0x1b4   : > { %p919_p4 = scmp.lt.u32.totalorder %s917_s26, %s913_s8  ;;  %p921_p13 = scmp.lt.u32.totalorder %s913_s8, %s1227_s4 }
 0x1b5   : > { %p915_p8 = pnand %p914_p3, %p1326_p1 }
 0x1b6   : > { %p920_p6 = por %p919_p4, %p918_p2 }
 0x1b7   : > { %p916_p0 = pneg %p915_p8 }
 0x1b8   : > { %p922_p12 = por %p921_p13, %p920_p6 }
 0x1ba   : > { %p923_p10 = pnand %p922_p12, %p916_p0 }
 0x1bc   : > { %926 = shalt.err (!%p923_p10)
}
 0x1bd   : > { %s1008_s20 = smov 128   ;;  %s1009_s29 = smov 8  }
 0x1be   : > { %783 = dma.vmem_to_hbm [thread:$0]  (%p1326_p1), %s1220_s10, 256, %s1227_s4, %s536_s5, %s1008_s20, %s1008_s20, %s1009_s29  }
 0x1bf   : > { %s232_s17 = scalar_lea.vmem [#allocation7], %s1194_s30  ;;  %s1264_s8 = scalar_lea.hbm %s1315_s2, %s727_s11 }
 0x1c0   : > { %s549_s28 = sshll.u32 %s232_s17, 4  ;;  %s531_s10 = scalar_lea.sflag [#allocation4], %s1191_s6  ;;  %s1257_s28 = int_to_ptr.vmem [resolvable:$true] %s549_s28 }
 0x1c1   : > { %s927_s30 = scalar_lea.vmem %s1257_s28, 256  ;;  %s1010_s4 = smov [#allocation7]  }
 0x1c2   : > { %p928_p5 = scmp.ne.s32.totalorder %s1257_s28, %s927_s30  ;;  %s931_s5 = sshll.u32 %s1010_s4, 4  ;;  %s932_s5 = int_to_ptr.vmem [resolvable:$false] %s931_s5 }
 0x1c3   : > { %s933_s16 = scalar_lea.vmem %s932_s5, 512  ;;  %p934_p11 = scmp.lt.s32.totalorder %s1257_s28, %s932_s5 }
 0x1c4   : > { %p929_p7 = pnand %p928_p5, %p1326_p1  ;;  %p935_p3 = scmp.lt.s32.totalorder %s933_s16, %s927_s30 }
 0x1c6   : > { %p930_p9 = pneg %p929_p7  ;;  %p936_p8 = por %p935_p3, %p934_p11 }
 0x1c8   : > { %p937_p0 = pnand %p936_p8, %p930_p9 }
 0x283   : > { %v761_v12 = vpop.f32.mrb[2].mxu0 }
 0x284   : > { %529 = vst.msk [vmem:[%s232_s17 + $0x8] sm:$0xff] %vm244_vm0, %v761_v12  ;;  %v519_v13 = vpop.f32.mrb[3].mxu0 }
 0x285   : > { %528 = vst.msk [vmem:[%s232_s17] sm:$0xff] %vm244_vm0, %v519_v13 }
 0x286   : > { %940 = shalt.err (!%p937_p0)
}
 0x287   : > { %s941_s11 = scalar_lea.hbm %s1264_s8, 256  ;;  %s945_s26 = scalar_lea.hbm %s1315_s2, 512 }
 0x288   : > { %p942_p2 = scmp.ne.s32.totalorder %s1264_s8, %s941_s11  ;;  %p946_p13 = scmp.lt.u32.totalorder %s1264_s8, %s1315_s2 }
 0x289   : > { %p947_p12 = scmp.lt.u32.totalorder %s945_s26, %s941_s11  ;;  %p949_p5 = scmp.lt.u32.totalorder %s941_s11, %s1264_s8 }
 0x28a   : > { %p943_p4 = pnand %p942_p2, %p1326_p1 }
 0x28b   : > { %p948_p10 = por %p947_p12, %p946_p13 }
 0x28c   : > { %p944_p6 = pneg %p943_p4 }
 0x28d   : > { %p950_p7 = por %p949_p5, %p948_p10 }
 0x28f   : > { %p951_p9 = pnand %p950_p7, %p944_p6 }
 0x291   : > { %954 = shalt.err (!%p951_p9)
}
 0x292   : > { %782 = dma.vmem_to_hbm [thread:$0]  (%p1326_p1), %s1257_s28, 256, %s1264_s8, %s531_s10, %s1008_s20, %s1008_s20, %s1009_s29  }
 0x293 PF: > { %s580_s17 = sand.u32 1, %s989_s12   ;;  %p1327_p11 = scmp.ne.s32.totalorder %s1322_s25, 0 }
 0x294   : > { %p1328_p3 = scmp.ge.s32.totalorder %s1001_s15, 2  ;;  %s581_s19 = scalar_lea.sflag [#allocation4], %s580_s17 }
 0x296   : > { %p794_p8 = pnand %p1328_p3, %p1327_p11 }
 0x298   : > { %980 = dma.done.wait (!%p794_p8), %s581_s19, 256  }
 0x299   : > { %982 = vsyncadd (!%p794_p8), %s581_s19, 4294967040  ;;  %s590_s24 = scalar_lea.sflag [#allocation9], %s580_s17 }
 0x29a   : > { %984 = dma.done.wait (!%p794_p8), %s590_s24, 256  }
 0x29b   : > { %986 = vsyncadd (!%p794_p8), %s590_s24, 4294967040  ;;  %p23_p1 = scmp.ge.s32.totalorder %s1056_s18, 4   ;;  %s1329_s12 = smov %s993_s13 }
 0x29c   : > { %s1330_s13 = smov %s997_s14  ;;  %s1331_s14 = smov %s1068_s21 }
 0x29d   : > { %s1332_s15 = smov %s1056_s18  ;;  %25 = sbr.rel (!%p23_p1) target bundleno = 9 (0x9), region = 103 }
 0x2a4   :  { %595 = vsyncpa [#allocation3], 1 }
 0x2a5   :  { %597 = vsyncpa [#allocation3 + $0x1], 1 }
 0x2a6   :  { %598 = vsyncpa [#allocation6], 1 }
 0x2a7   :  { %600 = vsyncpa [#allocation6 + $0x1], 1 }
 0x2a8   :  { %601 = vsyncpa [#allocation4], 1 }
 0x2a9   :  { %603 = vsyncpa [#allocation4 + $0x1], 1 }
 0x2aa   :  { %604 = vsyncpa [#allocation9], 1 }
 0x2ab   :  { %606 = vsyncpa [#allocation9 + $0x1], 1 }

</bundles_post_ra>
